<compile_context>
chip_gen: v7x
topology: tpu7x:2x2x1
jax: 0.10.0
libtpu: 0.0.40
codegen_flags: <defaults>
</compile_context>

<pallas_src>
import jax
import jax.numpy as jnp
from jax.experimental import pallas as pl
from jax.experimental.pallas import tpu as pltpu


def _diff_unpool_kernel(xu_ref, a_ref, s_ref, w_ref, b_ref, xd_ref, out_ref):
    # xu_ref:  (1, C, TN)    bf16  x_up tile (this batch element, this N tile)
    # a_ref:   (1, C, 1)     f32   folded InstanceNorm*BatchNorm scale (per b, c)
    # s_ref:   (1, C, 1)     f32   folded shift (already includes -mean * scale)
    # w_ref:   (Pp, C)       bf16  1x1-conv weight (padded rows are zero)
    # b_ref:   (Pp, 1)       f32   conv bias (padded rows are -1e9 -> softmax weight 0)
    # xd_ref:  (1, D+1, Pp)  bf16  x_down with an appended ones row (row D)
    # out_ref: (1, D, TN)
    d_out = out_ref.shape[1]

    # Folded InstanceNorm + inference BatchNorm + ReLU, all math in f32.
    xu = xu_ref[0].astype(jnp.float32)                           # (C, TN)
    h = jnp.maximum(xu * a_ref[0] + s_ref[0], 0.0)               # (C, TN)

    # 1x1 conv on the MXU: embed[p, n] = sum_c W[p, c] * h[c, n] + b[p].
    embed = jnp.dot(w_ref[...], h.astype(jnp.bfloat16),
                    preferred_element_type=jnp.float32)          # (Pp, TN)
    embed = embed + b_ref[...]

    # Softmax over P (rows); normalization deferred past the second matmul.
    m = jnp.max(embed, axis=0, keepdims=True)                    # (1, TN)
    e = jnp.exp(embed - m).astype(jnp.bfloat16)                  # (Pp, TN)

    # un[:D] = x_down @ e ; un[D] = column sums of e (ones row folded into x_down).
    un = jnp.dot(xd_ref[0], e, preferred_element_type=jnp.float32)   # (D+1, TN)
    inv = pl.reciprocal(un[d_out:d_out + 1, :], approx=False)        # (1, TN)
    out_ref[0] = (un[:d_out, :] * inv).astype(out_ref.dtype)


def diff_unpool_forward(x_up, x_down, bn_gamma, bn_beta, bn_mean, bn_var,
                        conv_w, conv_b, *, bn_eps=1e-5, in_eps=1e-3,
                        out_dtype=jnp.float32, tile_n=512):
    """x_up: [B, C, N, 1], x_down: [B, D, P, 1].  Returns [B, D, N, 1]."""
    B, C, N, Wu = x_up.shape
    Bd, D, P, Wd = x_down.shape
    assert Wu == 1 and Wd == 1 and Bd == B
    assert conv_w.shape[0] == P, "output_points must match x_down spatial dim"

    f32 = jnp.float32
    xu = x_up.reshape(B, C, N).astype(f32)

    # Per-(b,c) InstanceNorm stats (biased var over N) computed once in XLA and
    # folded with inference BatchNorm into one scale + shift per (b, c).
    mu = jnp.mean(xu, axis=-1, keepdims=True)                         # (B, C, 1)
    var = jnp.mean(jnp.square(xu - mu), axis=-1, keepdims=True)       # (B, C, 1)
    bn_scale = (bn_gamma / jnp.sqrt(bn_var + bn_eps)).astype(f32)     # (C,)
    bn_shift = (bn_beta - bn_mean * bn_scale).astype(f32)             # (C,)
    a = jax.lax.rsqrt(var + in_eps) * bn_scale[None, :, None]         # (B, C, 1)
    s = bn_shift[None, :, None] - mu * a                              # (B, C, 1)

    # Lane-dense padding: N tiled by TN (multiple of 128), P padded to 128 multiple.
    TN = min(int(tile_n), pl.cdiv(N, 128) * 128)
    TN = pl.cdiv(TN, 128) * 128
    Np = pl.cdiv(N, TN) * TN
    Pp = pl.cdiv(P, 128) * 128

    # bf16 at the HBM boundary for the big streams; padded columns are zeros.
    xu_b = jnp.pad(xu.astype(jnp.bfloat16), ((0, 0), (0, 0), (0, Np - N)))
    w = jnp.pad(conv_w.reshape(P, C).astype(jnp.bfloat16), ((0, Pp - P), (0, 0)))
    # Padded P rows get a very negative bias -> exp(embed - m) == 0 for them.
    b = jnp.pad(conv_b.reshape(P, 1).astype(f32), ((0, Pp - P), (0, 0)),
                constant_values=-1e9)
    # Append a ones row so the softmax column sums fall out of the second matmul.
    xd = jnp.concatenate(
        [x_down.reshape(B, D, P).astype(f32), jnp.ones((B, 1, P), f32)], axis=1)
    xd = jnp.pad(xd, ((0, 0), (0, 0), (0, Pp - P))).astype(jnp.bfloat16)

    # Shape-derived VMEM budget (double-buffered blocks + in-kernel temporaries),
    # clamped so it also fits v7x's 64 MiB physical VMEM with headroom.
    out_itemsize = jnp.dtype(out_dtype).itemsize
    blk_bytes = (C * TN * 2 + 2 * C * 4 + Pp * C * 2 + Pp * 4
                 + (D + 1) * Pp * 2 + D * TN * out_itemsize)
    tmp_bytes = (C * TN * 4 + Pp * TN * (4 + 2) + (D + 1) * TN * 4)
    vmem_limit = int(min(max(2 * blk_bytes + tmp_bytes + (4 << 20), 16 << 20),
                         48 << 20))

    out = pl.pallas_call(
        _diff_unpool_kernel,
        out_shape=jax.ShapeDtypeStruct((B, D, Np), out_dtype),
        grid_spec=pltpu.PrefetchScalarGridSpec(
            num_scalar_prefetch=0,
            grid=(B, Np // TN),
            in_specs=[
                pl.BlockSpec((1, C, TN), lambda bi, ni: (bi, 0, ni)),
                pl.BlockSpec((1, C, 1), lambda bi, ni: (bi, 0, 0)),
                pl.BlockSpec((1, C, 1), lambda bi, ni: (bi, 0, 0)),
                pl.BlockSpec((Pp, C), lambda bi, ni: (0, 0)),
                pl.BlockSpec((Pp, 1), lambda bi, ni: (0, 0)),
                pl.BlockSpec((1, D + 1, Pp), lambda bi, ni: (bi, 0, 0)),
            ],
            out_specs=pl.BlockSpec((1, D, TN), lambda bi, ni: (bi, 0, ni)),
        ),
        compiler_params=pltpu.CompilerParams(
            dimension_semantics=("parallel", "parallel"),
            vmem_limit_bytes=vmem_limit,
        ),
    )(xu_b, a, s, w, b, xd)

    return out[:, :, :N].reshape(B, D, N, 1)


def _reference(x_up, x_down, bn_gamma, bn_beta, bn_mean, bn_var, conv_w,
               conv_b, *, bn_eps=1e-5, in_eps=1e-3):
    B, C, N, _ = x_up.shape
    P = conv_w.shape[0]
    xu = x_up.reshape(B, C, N).astype(jnp.float32)
    mean = jnp.mean(xu, axis=-1, keepdims=True)
    var = jnp.mean((xu - mean) ** 2, axis=-1, keepdims=True)
    h = (xu - mean) / jnp.sqrt(var + in_eps)
    h = (h - bn_mean[None, :, None]) / jnp.sqrt(bn_var[None, :, None] + bn_eps)
    h = h * bn_gamma[None, :, None] + bn_beta[None, :, None]
    h = jnp.maximum(h, 0.0)
    embed = jnp.einsum('pc,bcn->bpn', conv_w.reshape(P, C), h)
    embed = embed + conv_b[None, :, None]
    s = jax.nn.softmax(embed, axis=1)                        # softmax over P
    out = jnp.einsum('bdp,bpn->bdn', x_down.reshape(B, -1, P), s)
    return out[..., None]


if __name__ == "__main__":
    # batch, in_channel, num points (x_up), output_points (x_down spatial),
    # x_down channels.
    B, C, N, P, D = 2, 8, 64, 16, 8

    key = jax.random.PRNGKey(0)
    ku, kd, kw, kb = jax.random.split(key, 4)

    x_up = jax.random.normal(ku, (B, C, N, 1), dtype=jnp.float32)
    x_down = jax.random.normal(kd, (B, D, P, 1), dtype=jnp.float32)

    # Parameters, deterministic init (PyTorch-default-like, inference BN stats).
    bn_gamma = jnp.ones((C,), jnp.float32)
    bn_beta = jnp.zeros((C,), jnp.float32)
    bn_mean = jnp.zeros((C,), jnp.float32)
    bn_var = jnp.ones((C,), jnp.float32)
    conv_w = jax.random.normal(kw, (P, C, 1, 1), jnp.float32) * (1.0 / jnp.sqrt(C))
    conv_b = jax.random.normal(kb, (P,), jnp.float32) * 0.01

    out = diff_unpool_forward(x_up, x_down, bn_gamma, bn_beta, bn_mean, bn_var,
                              conv_w, conv_b)
    out = jax.block_until_ready(out)

    ref = _reference(x_up, x_down, bn_gamma, bn_beta, bn_mean, bn_var,
                     conv_w, conv_b)
    assert out.shape == (B, D, N, 1)
    # bf16 HBM streams + bf16 MXU operands (f32 accumulation) -> loose tolerance
    # vs the all-f32 reference.
    assert jnp.allclose(out, ref, rtol=4e-2, atol=4e-2), "mismatch vs reference"

    print("KERNEL_OK")
</pallas_src>

<mosaic_0001>
module attributes {stable_mosaic.version = 11 : i64} {
  func.func @_diff_unpool_kernel(%arg0: i32, %arg1: i32, %arg2: memref<1x8x128xbf16, #tpu.memory_space<vmem>>, %arg3: memref<1x8x1xf32, #tpu.memory_space<vmem>>, %arg4: memref<1x8x1xf32, #tpu.memory_space<vmem>>, %arg5: memref<128x8xbf16, #tpu.memory_space<vmem>>, %arg6: memref<128x1xf32, #tpu.memory_space<vmem>>, %arg7: memref<1x9x128xbf16, #tpu.memory_space<vmem>>, %arg8: memref<1x8x128xf32, #tpu.memory_space<vmem>>) attributes {dimension_semantics = [#tpu.dimension_semantics<parallel>, #tpu.dimension_semantics<parallel>], iteration_bounds = array<i64: 2, 1>, scalar_prefetch = 0 : i64, scratch_operands = 0 : i64, tpu.core_type = #tpu.core_type<tc>, window_params = [{transform_indices = @transform_0, window_bounds = array<i64: 1, 8, 128>}, {transform_indices = @transform_1, window_bounds = array<i64: 1, 8, 1>}, {transform_indices = @transform_2, window_bounds = array<i64: 1, 8, 1>}, {pipeline_mode = #tpu.pipeline_mode<synchronous>, transform_indices = @transform_3, window_bounds = array<i64: 128, 8>}, {pipeline_mode = #tpu.pipeline_mode<synchronous>, transform_indices = @transform_4, window_bounds = array<i64: 128, 1>}, {transform_indices = @transform_5, window_bounds = array<i64: 1, 9, 128>}, {transform_indices = @transform_6, window_bounds = array<i64: 1, 8, 128>}]} {
    %c0 = arith.constant 0 : index
    %c0_0 = arith.constant 0 : index
    %c0_1 = arith.constant 0 : index
    %0 = vector.load %arg2[%c0, %c0_0, %c0_1] : memref<1x8x128xbf16, #tpu.memory_space<vmem>>, vector<1x8x128xbf16>
    %1 = vector.shape_cast %0 : vector<1x8x128xbf16> to vector<8x128xbf16>
    %2 = arith.extf %1 : vector<8x128xbf16> to vector<8x128xf32>
    %c0_2 = arith.constant 0 : index
    %c0_3 = arith.constant 0 : index
    %c0_4 = arith.constant 0 : index
    %3 = vector.load %arg3[%c0_2, %c0_3, %c0_4] : memref<1x8x1xf32, #tpu.memory_space<vmem>>, vector<1x8x1xf32>
    %4 = vector.shape_cast %3 : vector<1x8x1xf32> to vector<8x1xf32>
    %5 = vector.broadcast %4 : vector<8x1xf32> to vector<8x128xf32>
    %6 = arith.mulf %2, %5 : vector<8x128xf32>
    %c0_5 = arith.constant 0 : index
    %c0_6 = arith.constant 0 : index
    %c0_7 = arith.constant 0 : index
    %7 = vector.load %arg4[%c0_5, %c0_6, %c0_7] : memref<1x8x1xf32, #tpu.memory_space<vmem>>, vector<1x8x1xf32>
    %8 = vector.shape_cast %7 : vector<1x8x1xf32> to vector<8x1xf32>
    %9 = vector.broadcast %8 : vector<8x1xf32> to vector<8x128xf32>
    %10 = arith.addf %6, %9 : vector<8x128xf32>
    %cst = arith.constant 0.000000e+00 : f32
    %11 = vector.broadcast %cst : f32 to vector<8x128xf32>
    %12 = arith.maximumf %10, %11 : vector<8x128xf32>
    %c0_8 = arith.constant 0 : index
    %c0_9 = arith.constant 0 : index
    %13 = vector.load %arg5[%c0_8, %c0_9] : memref<128x8xbf16, #tpu.memory_space<vmem>>, vector<128x8xbf16>
    %14 = arith.truncf %12 : vector<8x128xf32> to vector<8x128xbf16>
    %cst_10 = arith.constant dense<0.000000e+00> : vector<128x128xf32>
    %15 = tpu.matmul %13, %14, %cst_10 {dimension_numbers = #tpu.dot_dimension_numbers<[1], [0], [0], [1], [0, 0, 1, 1], [], []>} : vector<128x8xbf16>, vector<8x128xbf16>, vector<128x128xf32> -> vector<128x128xf32>
    %c0_11 = arith.constant 0 : index
    %c0_12 = arith.constant 0 : index
    %16 = vector.load %arg6[%c0_11, %c0_12] : memref<128x1xf32, #tpu.memory_space<vmem>>, vector<128x1xf32>
    %17 = vector.broadcast %16 : vector<128x1xf32> to vector<128x128xf32>
    %18 = arith.addf %15, %17 : vector<128x128xf32>
    %cst_13 = arith.constant dense<0xFF800000> : vector<128xf32>
    %19 = vector.multi_reduction <maximumf>, %18, %cst_13 [0] : vector<128x128xf32> to vector<128xf32>
    %20 = vector.shape_cast %19 : vector<128xf32> to vector<1x128xf32>
    %21 = vector.broadcast %20 : vector<1x128xf32> to vector<128x128xf32>
    %22 = arith.subf %18, %21 : vector<128x128xf32>
    %23 = math.exp %22 : vector<128x128xf32>
    %24 = arith.truncf %23 : vector<128x128xf32> to vector<128x128xbf16>
    %c0_14 = arith.constant 0 : index
    %c0_15 = arith.constant 0 : index
    %c0_16 = arith.constant 0 : index
    %25 = vector.load %arg7[%c0_14, %c0_15, %c0_16] : memref<1x9x128xbf16, #tpu.memory_space<vmem>>, vector<1x9x128xbf16>
    %26 = vector.shape_cast %25 : vector<1x9x128xbf16> to vector<9x128xbf16>
    %cst_17 = arith.constant dense<0.000000e+00> : vector<9x128xf32>
    %27 = tpu.matmul %26, %24, %cst_17 {dimension_numbers = #tpu.dot_dimension_numbers<[1], [0], [0], [1], [0, 0, 1, 1], [], []>} : vector<9x128xbf16>, vector<128x128xbf16>, vector<9x128xf32> -> vector<9x128xf32>
    %28 = vector.extract_strided_slice %27 {offsets = [8, 0], sizes = [1, 128], strides = [1, 1]} : vector<9x128xf32> to vector<1x128xf32>
    %29 = tpu.reciprocal %28 : vector<1x128xf32> -> vector<1x128xf32>
    %30 = vector.extract_strided_slice %27 {offsets = [0, 0], sizes = [8, 128], strides = [1, 1]} : vector<9x128xf32> to vector<8x128xf32>
    %31 = vector.broadcast %29 : vector<1x128xf32> to vector<8x128xf32>
    %32 = arith.mulf %30, %31 : vector<8x128xf32>
    %c0_18 = arith.constant 0 : index
    %c0_19 = arith.constant 0 : index
    %c0_20 = arith.constant 0 : index
    %33 = vector.load %arg8[%c0_18, %c0_19, %c0_20] : memref<1x8x128xf32, #tpu.memory_space<vmem>>, vector<1x8x128xf32>
    %34 = vector.shape_cast %33 : vector<1x8x128xf32> to vector<8x128xf32>
    %35 = vector.shape_cast %32 : vector<8x128xf32> to vector<1x8x128xf32>
    tpu.vector_store %arg8[%c0_18, %c0_19, %c0_20], %35 {strides = array<i32>} : memref<1x8x128xf32, #tpu.memory_space<vmem>>, vector<1x8x128xf32>,
    return
  }
  func.func @transform_0(%arg0: i32, %arg1: i32) -> (i32, i32, i32) {
    %c0_i32 = arith.constant 0 : i32
    %c0_i32_0 = arith.constant 0 : i32
    return %arg0, %c0_i32, %arg1 : i32, i32, i32
  }
  func.func @transform_1(%arg0: i32, %arg1: i32) -> (i32, i32, i32) {
    %c0_i32 = arith.constant 0 : i32
    %c0_i32_0 = arith.constant 0 : i32
    %c0_i32_1 = arith.constant 0 : i32
    return %arg0, %c0_i32, %c0_i32_0 : i32, i32, i32
  }
  func.func @transform_2(%arg0: i32, %arg1: i32) -> (i32, i32, i32) {
    %c0_i32 = arith.constant 0 : i32
    %c0_i32_0 = arith.constant 0 : i32
    %c0_i32_1 = arith.constant 0 : i32
    return %arg0, %c0_i32, %c0_i32_0 : i32, i32, i32
  }
  func.func @transform_3(%arg0: i32, %arg1: i32) -> (i32, i32) {
    %c0_i32 = arith.constant 0 : i32
    %c0_i32_0 = arith.constant 0 : i32
    %c0_i32_1 = arith.constant 0 : i32
    return %c0_i32, %c0_i32_0 : i32, i32
  }
  func.func @transform_4(%arg0: i32, %arg1: i32) -> (i32, i32) {
    %c0_i32 = arith.constant 0 : i32
    %c0_i32_0 = arith.constant 0 : i32
    %c0_i32_1 = arith.constant 0 : i32
    return %c0_i32, %c0_i32_0 : i32, i32
  }
  func.func @transform_5(%arg0: i32, %arg1: i32) -> (i32, i32, i32) {
    %c0_i32 = arith.constant 0 : i32
    %c0_i32_0 = arith.constant 0 : i32
    %c0_i32_1 = arith.constant 0 : i32
    return %arg0, %c0_i32, %c0_i32_0 : i32, i32, i32
  }
  func.func @transform_6(%arg0: i32, %arg1: i32) -> (i32, i32, i32) {
    %c0_i32 = arith.constant 0 : i32
    %c0_i32_0 = arith.constant 0 : i32
    return %arg0, %c0_i32, %arg1 : i32, i32, i32
  }
}

</mosaic_0001>

<bundles_post_ra>
// kernel: tpu_custom_call.1
= control target key start
LH: loop header
LB: loop body
LE: loop exit
PB: predicated region body
PF: predicated region fallthrough
CT: control target
= control target key end

     0   :  { %11 = vsyncpa [#allocation3], 0  ;;  %s1450_s0 = inlined_call_operand.vmem [shape: bf16[2,8,128], index: 0, kind: input, shape index: {}]   ;;  %s1451_s1 = inlined_call_operand.vmem [shape: f32[2,8,1], index: 1, kind: input, shape index: {}]   ;;  %s1452_s2 = inlined_call_operand.vmem [shape: f32[2,8,1], index: 2, kind: input, shape index: {}]   ;;  %s1453_s3 = inlined_call_operand.vmem [shape: bf16[128,8], index: 3, kind: input, shape index: {}]   ;;  %s1454_s4 = inlined_call_operand.vmem [shape: f32[128,1], index: 4, kind: input, shape index: {}]   ;;  %s1455_s5 = inlined_call_operand.vmem [shape: bf16[2,9,128], index: 5, kind: input, shape index: {}]   ;;  %s1456_s6 = inlined_call_operand.hbm [shape: f32[2,8,128], index: 6, kind: output, shape index: {}]  }
   0x1   :  { %13 = vsyncpa [#allocation3 + $0x1], 0  ;;  %s1190_s21 = smov 0   ;;  %s1192_s22 = smov 0  }
   0x2   :  { %s1194_s23 = smov 0   ;;  %s1196_s24 = smov 0  }
   0x3   :  { %s1198_s25 = smov 0   ;;  %s1200_s26 = smov 0  }
   0x4 LB: > { %s878_s27 = sadd.s32 4294967295, %s1149_s26   ;;  %s879_s28 = sadd.s32 4294967294, %s1149_s26   ;;  %s1149_s26 = sphi %s1200_s26, %s19_s26   ;;  %s1145_s25 = sphi %s1198_s25, %s1463_s25   ;;  %s1141_s24 = sphi %s1196_s24, %s1462_s24   ;;  %s1137_s23 = sphi %s1194_s23, %s1461_s23   ;;  %s1133_s22 = sphi %s1192_s22, %s1460_s22   ;;  %s1129_s21 = sphi %s1190_s21, %s1459_s21  }
   0x5   : > { %s31_s29 = sadd.s32 1, %s1145_s25  ;;  %s188_s30 = sadd.s32 1, %s1137_s23 }
   0x6   : > { %p33_p0 = scmp.ge.s32.totalorder %s31_s29, 2  ;;  %p198_p1 = scmp.ne.s32.totalorder %s1137_s23, %s1133_s22 }
   0x7   : > { %p199_p2 = scmp.eq.s32.totalorder %s878_s27, 1  ;;  %p204_p3 = scmp.ne.s32.totalorder %s1133_s22, %s1129_s21 }
   0x8   : > { %s1465_s29 = smov (%p33_p0, %s31_s29), 0  ;;  %p205_p5 = scmp.eq.s32.totalorder %s879_s28, 1 }
   0x9   : > { %p1230_p4 = por %p199_p2, %p198_p1  ;;  %s183_s8 = ssub.s32 %s1145_s25, %s1465_s29 }
   0xa   : > { %p882_p6 = scmp.ge.s32.totalorder %s1149_s26, 1  ;;  %p186_p7 = scmp.eq.s32.totalorder %s183_s8, 0 }
   0xb   : > { %p1237_p8 = por %p205_p5, %p204_p3  ;;  %p261_p9 = scmp.lt.s32.totalorder %s1149_s26, 3 }
   0xc   : > { %s1243_s10 = scalar_select %p186_p7, %s1137_s23, %s188_s30  }
   0xd   : > { %p262_p10 = pnand %p882_p6, %p261_p9 }
   0xe   : > { %p306_p11 = scmp.lt.s32.totalorder (!%p262_p10), %s1141_s24, 1  ;;  %v1151_v0 = vmov (!%p262_p10), 0   ;;  %v363_v3 = vld [vmem:[%s1454_s4 + $0x10] sm:$0xff] (!%p262_p10)  ;;  %v365_v4 = vld [vmem:[%s1454_s4 + $0x20] sm:$0xff] (!%p262_p10)  ;;  %vm497_vm0 = vcmask (!%p262_p10), 64512   ;;  %v362_v12 = vld [vmem:[%s1454_s4 + $0x8] sm:$0xff] (!%p262_p10) }
   0xf   : > { %265 = sbr.rel (%p262_p10) target bundleno = 721 (0x2d1), region = 44  ;;  %1026 = vset.pattern.permute.xlu0 (!%p262_p10), %v1151_v0  ;;  %1027 = vset.pattern.permute.xlu1 (!%p262_p10), %v1151_v0  ;;  %v1028_v5 = vld [vmem:[%s1453_s3] sm:$0xff] (!%p262_p10)   ;;  %v367_v6 = vld [vmem:[%s1454_s4 + $0x30] sm:$0xff] (!%p262_p10)  ;;  %v364_v13 = vld [vmem:[%s1454_s4 + $0x18] sm:$0xff] (!%p262_p10)  ;;  %vm522_vm1 = vcmask (!%p262_p10), 1043456   ;;  %v1152_v36 = vmov (!%p262_p10), 0.0  }
  0x10   : > { %931 = vmatprep.mubr.msk.bf16.mxu0 (!%p262_p10), %vm497_vm0, %v1028_v5  ;;  %v369_v7 = vld [vmem:[%s1454_s4 + $0x40] sm:$0xff] (!%p262_p10)  ;;  %v371_v8 = vld [vmem:[%s1454_s4 + $0x50] sm:$0xff] (!%p262_p10)  ;;  %v366_v14 = vld [vmem:[%s1454_s4 + $0x28] sm:$0xff] (!%p262_p10)  ;;  %947 = vmatprep.subr.bf16.mxu1 (!%p262_p10), %v1152_v36  ;;  %vm1153_vm2 = vmmov (!%p262_p10), 0   ;;  %s907_s20 = sshll.u32 (!%p262_p10), %s1141_s24, 7 }
  0x11   : > { %v373_v9 = vld [vmem:[%s1454_s4 + $0x60] sm:$0xff] (!%p262_p10)  ;;  %v375_v10 = vld [vmem:[%s1454_s4 + $0x70] sm:$0xff] (!%p262_p10)  ;;  %v368_v15 = vld [vmem:[%s1454_s4 + $0x38] sm:$0xff] (!%p262_p10)  ;;  %963 = vmatprep.mubr.msk.bf16.mxu1 (!%p262_p10), %vm1153_vm2, %v1152_v36  ;;  %s1403_s8 = scalar_lea.hbm (!%p262_p10), %s1456_s6, %s907_s20 }
  0x12   : > { %v361_v11 = vld [vmem:[%s1454_s4] sm:$0xff] (!%p262_p10)  ;;  %v370_v16 = vld [vmem:[%s1454_s4 + $0x48] sm:$0xff] (!%p262_p10)  ;;  %v372_v17 = vld [vmem:[%s1454_s4 + $0x58] sm:$0xff] (!%p262_p10) }
  0x13   : > { %379 = vperm.xlu1 (!%p262_p10), %1027, %v361_v11   ;;  %v374_v18 = vld [vmem:[%s1454_s4 + $0x68] sm:$0xff] (!%p262_p10)  ;;  %v376_v19 = vld [vmem:[%s1454_s4 + $0x78] sm:$0xff] (!%p262_p10)  ;;  %v1030_v30 = vld [vmem:[%s1453_s3 + $0x10] sm:$0xff] (!%p262_p10)  }
  0x14   : > { %v1029_v29 = vld [vmem:[%s1453_s3 + $0x8] sm:$0xff] (!%p262_p10)   ;;  %v1031_v31 = vld [vmem:[%s1453_s3 + $0x18] sm:$0xff] (!%p262_p10)   ;;  %v1032_v32 = vld [vmem:[%s1453_s3 + $0x20] sm:$0xff] (!%p262_p10)  }
  0x15   : > { %v1033_v33 = vld [vmem:[%s1453_s3 + $0x28] sm:$0xff] (!%p262_p10)   ;;  %v1034_v34 = vld [vmem:[%s1453_s3 + $0x30] sm:$0xff] (!%p262_p10)   ;;  %v1035_v35 = vld [vmem:[%s1453_s3 + $0x38] sm:$0xff] (!%p262_p10)  }
  0x16   : > { %s1247_s11 = scalar_select %p306_p11, %s1141_s24, 1 }
  0x17   : > { %384 = vperm.xlu1 %1027, %v362_v12   ;;  %s1154_s24 = smov [#allocation2]  }
  0x18   : > { %s1250_s12 = sshll.u32 %s1247_s11, 3  ;;  %s884_s30 = sshll.u32 %s1247_s11, 2 }
  0x19   : > { %s316_s15 = scalar_lea.vmem %s1451_s1, %s1250_s12  ;;  %s320_s18 = scalar_lea.vmem %s1452_s2, %s1250_s12 }
  0x1a   : > { %v329_v1 = vld [vmem:[%s316_s15] sm:$0xff]  ;;  %s325_s27 = scalar_lea.vmem %s1455_s5, %s1250_s12  ;;  %s312_s14 = scalar_lea.vmem %s1450_s0, %s884_s30 }
  0x1b   : > { %332 = vperm.xlu0 %1026, %v329_v1   ;;  %v336_v2 = vld [vmem:[%s320_s18] sm:$0xff]  ;;  %394 = vperm.xlu1 %1027, %v364_v13   ;;  %s303_s18 = sand.u32 1, %s1133_s22   ;;  %s1075_s15 = sshll.u32 %s1154_s24, 4  ;;  %s1076_s15 = int_to_ptr.vmem [resolvable:$false] %s1075_s15 }
  0x1c   : > { %v327_v20 = vld [vmem:[%s312_s14] sm:$0xf]  ;;  %s883_s19 = sshll.u32 %s303_s18, 3  ;;  %s757_s13 = scalar_lea.sflag [#allocation3], %s303_s18 }
  0x1d   : > { %v328_v21 = vunpack.c.l.bf16 %v327_v20  ;;  %s305_s28 = scalar_lea.vmem [#allocation2], %s883_s19  ;;  %s1077_s16 = scalar_lea.vmem %s1076_s15, 256 }
  0x1e   : > { %s771_s30 = sshll.u32 %s305_s28, 4  ;;  %s1405_s30 = int_to_ptr.vmem [resolvable:$true] %s771_s30 }
  0x1f   : > { %339 = vperm.xlu0 %1026, %v336_v2   ;;  %404 = vperm.xlu1 %1027, %v366_v14   ;;  %s1071_s14 = scalar_lea.vmem %s1405_s30, 128  ;;  %p1078_p1 = scmp.lt.s32.totalorder %s1405_s30, %s1076_s15 }
  0x20   : > { %p1072_p12 = scmp.ne.s32.totalorder %s1405_s30, %s1071_s14  ;;  %p1079_p2 = scmp.lt.s32.totalorder %s1077_s16, %s1071_s14 }
  0x22   : > { %p1073_p13 = pnand %p1072_p12, %p1230_p4  ;;  %p1080_p3 = por %p1079_p2, %p1078_p1 }
  0x23   : > { %389 = vperm.xlu0 %1026, %v363_v3   ;;  %414 = vperm.xlu1 %1027, %v368_v15  }
  0x24   : > { %p1074_p0 = pneg %p1073_p13 }
  0x26   : > { %p1081_p5 = pnand %p1080_p3, %p1074_p0 }
  0x27   : > { %399 = vperm.xlu0 %1026, %v365_v4   ;;  %424 = vperm.xlu1 %1027, %v370_v16  }
  0x2b   : > { %409 = vperm.xlu0 %1026, %v367_v6   ;;  %434 = vperm.xlu1 %1027, %v372_v17  }
  0x2f   : > { %419 = vperm.xlu0 %1026, %v369_v7   ;;  %444 = vperm.xlu1 %1027, %v374_v18  }
  0x33   : > { %429 = vperm.xlu0 %1026, %v371_v8   ;;  %454 = vperm.xlu1 %1027, %v376_v19  }
  0x37   : > { %439 = vperm.xlu0 %1026, %v373_v9  }
  0x3b   : > { %449 = vperm.xlu0 %1026, %v375_v10  }
  0x92   : > { %v380_v37 = vpop.permute.xlu1 %379 }
  0x96   : > { %v385_v38 = vpop.permute.xlu1 %384 }
  0x9a   : > { %v333_v22 = vpop.permute.xlu0 %332  ;;  %v395_v40 = vpop.permute.xlu1 %394 }
  0x9b   : > { %v335_v23 = vmul.f32 %v333_v22, %v328_v21 }
  0x9e   : > { %v340_v24 = vpop.permute.xlu0 %339  ;;  %v405_v42 = vpop.permute.xlu1 %404 }
  0x9f   : > { %v342_v25 = vadd.f32 %v340_v24, %v335_v23 }
  0xa1   : > { %v343_v26 = vmax.f32 %v342_v25, 0.0 }
  0xa2   : > { %v390_v39 = vpop.permute.xlu0 %389  ;;  %v415_v46 = vpop.permute.xlu1 %414 }
  0xa3   : > { %v360_v27 = vpack.c.bf16 %v343_v26, %v343_v26 }
  0xa5   : > { %967 = vmatprep.subr.msk.bf16.mxu0 %vm522_vm1, %v360_v27  ;;  %v524_v28 = vsel %vm522_vm1, %v360_v27, 0 }
  0xa6   : > { %930 = vmatpush3.bf16.msra.mxu0 %v524_v28  ;;  %v400_v41 = vpop.permute.xlu0 %399  ;;  %v425_v50 = vpop.permute.xlu1 %424 }
  0xa9   : > { %932 = vmatmul.mubr.msk.bf16.vlgmr.msra.gmra.mrb[0].mxu0 %vm497_vm0, %v1029_v29 }
  0xaa   : > { %935 = vmatprep.mubr.msk.bf16.mxu0 %vm497_vm0, %v1030_v30  ;;  %v410_v43 = vpop.permute.xlu0 %409  ;;  %v435_v3 = vpop.permute.xlu1 %434 }
  0xae   : > { %v420_v49 = vpop.permute.xlu0 %419  ;;  %v445_v14 = vpop.permute.xlu1 %444 }
  0xb1   : > { %936 = vmatmul.mubr.msk.bf16.gmra.mrb[4].mxu0 %vm497_vm0, %v1031_v31 }
  0xb2   : > { %939 = vmatprep.mubr.msk.bf16.mxu0 %vm497_vm0, %v1032_v32  ;;  %v430_v62 = vpop.permute.xlu0 %429  ;;  %v455_v23 = vpop.permute.xlu1 %454 }
  0xb6   : > { %v440_v8 = vpop.permute.xlu0 %439 }
  0xb9   : > { %940 = vmatmul.mubr.msk.bf16.gmra.mrb[8].mxu0 %vm497_vm0, %v1033_v33 }
  0xba   : > { %943 = vmatprep.mubr.msk.bf16.mxu0 %vm497_vm0, %v1034_v34  ;;  %v450_v19 = vpop.permute.xlu0 %449 }
  0xc1   : > { %944 = vmatmul.mubr.msk.bf16.gmra.mrb[12].mxu0 %vm497_vm0, %v1035_v35 }
 0x17c   : > { %v933_v44 = vpop.f32.mrb[0].mxu0 }
 0x17d   : > { %v560_v45 = vpop.f32.mrb[1].mxu0  ;;  %v1350_v52 = vadd.f32 %v933_v44, %v390_v39 }
 0x17e   : > { %v934_v47 = vpop.f32.mrb[2].mxu0  ;;  %v561_v55 = vadd.f32 %v560_v45, %v380_v37 }
 0x17f   : > { %v563_v48 = vpop.f32.mrb[3].mxu0  ;;  %v1356_v58 = vadd.f32 %v934_v47, %v395_v40 }
 0x180   : > { %v564_v63 = vadd.f32 %v563_v48, %v385_v38 }
 0x184   : > { %v937_v51 = vpop.f32.mrb[4].mxu0 }
 0x185   : > { %v1352_v53 = vadd.f32 %v937_v51, %v410_v43  ;;  %v576_v54 = vpop.f32.mrb[5].mxu0 }
 0x186   : > { %v1354_v56 = vadd.f32 %v576_v54, %v400_v41  ;;  %v938_v57 = vpop.f32.mrb[6].mxu0 }
 0x187   : > { %v625_v59 = vmax.f32 %v1350_v52, %v1352_v53  ;;  %v1360_v60 = vadd.f32 %v938_v57, %v415_v46  ;;  %v579_v61 = vpop.f32.mrb[7].mxu0 }
 0x188   : > { %v623_v0 = vmax.f32 %v561_v55, %v1354_v56  ;;  %v580_v1 = vadd.f32 %v579_v61, %v405_v42 }
 0x189   : > { %v626_v2 = vmax.f32 %v1356_v58, %v1360_v60 }
 0x18a   : > { %v624_v4 = vmax.f32 %v564_v63, %v580_v1 }
 0x18c   : > { %v941_v5 = vpop.f32.mrb[8].mxu0 }
 0x18d   : > { %v1365_v6 = vadd.f32 %v941_v5, %v430_v62  ;;  %v592_v7 = vpop.f32.mrb[9].mxu0 }
 0x18e   : > { %v1367_v9 = vadd.f32 %v592_v7, %v420_v49  ;;  %v942_v10 = vpop.f32.mrb[10].mxu0 }
 0x18f   : > { %v629_v11 = vmax.f32 %v625_v59, %v1365_v6  ;;  %v1370_v12 = vadd.f32 %v942_v10, %v435_v3  ;;  %v595_v13 = vpop.f32.mrb[11].mxu0 }
 0x190   : > { %v627_v15 = vmax.f32 %v623_v0, %v1367_v9  ;;  %v596_v16 = vadd.f32 %v595_v13, %v425_v50 }
 0x191   : > { %v630_v17 = vmax.f32 %v626_v2, %v1370_v12 }
 0x192   : > { %v628_v18 = vmax.f32 %v624_v4, %v596_v16 }
 0x194   : > { %v945_v20 = vpop.f32.mrb[12].mxu0 }
 0x195   : > { %v1374_v21 = vadd.f32 %v945_v20, %v450_v19  ;;  %v608_v22 = vpop.f32.mrb[13].mxu0 }
 0x196   : > { %v609_v24 = vadd.f32 %v608_v22, %v440_v8  ;;  %v946_v25 = vpop.f32.mrb[14].mxu0 }
 0x197   : > { %v633_v26 = vmax.f32 %v629_v11, %v1374_v21  ;;  %v620_v27 = vadd.f32 %v946_v25, %v455_v23  ;;  %v611_v28 = vpop.f32.mrb[15].mxu0 }
 0x198   : > { %v631_v29 = vmax.f32 %v627_v15, %v609_v24  ;;  %v612_v30 = vadd.f32 %v611_v28, %v445_v14 }
 0x199   : > { %v634_v31 = vmax.f32 %v630_v17, %v620_v27 }
 0x19a   : > { %v632_v32 = vmax.f32 %v628_v18, %v612_v30 }
 0x19b   : > { %v636_v33 = vmax.f32 %v633_v26, %v634_v31 }
 0x19c   : > { %v635_v34 = vmax.f32 %v631_v29, %v632_v32 }
 0x19e   : > { %v637_v35 = vmax.f32 %v635_v34, %v636_v33 }
 0x1a0   : > { %v638_v37 = vrot.slane %v637_v35, 4 }
 0x1a2   : > { %v639_v38 = vmax.f32 %v637_v35, %v638_v37  ;;  %v1036_v35 = vld [vmem:[%s325_s27] sm:$0x1f]  }
 0x1a4   : > { %v640_v39 = vrot.slane %v639_v38, 2 }
 0x1a6   : > { %v641_v40 = vmax.f32 %v639_v38, %v640_v39 }
 0x1a8   : > { %v642_v41 = vrot.slane %v641_v40, 1 }
 0x1aa   : > { %v643_v42 = vmax.f32 %v641_v40, %v642_v41  ;;  %v750_v40 = vlaneseq }
 0x1ac   : > { %v657_v43 = vsub.f32 %v612_v30, %v643_v42  ;;  %v644_v44 = vsub.f32 %v561_v55, %v643_v42  ;;  %v645_v45 = vsub.f32 %v564_v63, %v643_v42  ;;  %v646_v46 = vsub.f32 %v1350_v52, %v643_v42 }
 0x1ad   : > { %v647_v47 = vsub.f32 %v1356_v58, %v643_v42  ;;  %v648_v48 = vsub.f32 %v1354_v56, %v643_v42  ;;  %v649_v49 = vsub.f32 %v580_v1, %v643_v42  ;;  %v650_v50 = vsub.f32 %v1352_v53, %v643_v42 }
 0x1ae   : > { %v686_v51 = vmul.f32 1.442695, %v657_v43  ;;  %v660_v54 = vmul.f32 1.442695, %v644_v44  ;;  %v662_v57 = vmul.f32 1.442695, %v645_v45  ;;  %v651_v59 = vsub.f32 %v1360_v60, %v643_v42 }
 0x1af   : > { %v664_v61 = vmul.f32 1.442695, %v646_v46  ;;  %v652_v62 = vsub.f32 %v1367_v9, %v643_v42  ;;  %v666_v55 = vmul.f32 1.442695, %v647_v47  ;;  %v668_v63 = vmul.f32 1.442695, %v648_v48 }
 0x1b0   : > { %1037 = vpow2.f32 %v686_v51  ;;  %v670_v52 = vmul.f32 1.442695, %v649_v49  ;;  %v653_v0 = vsub.f32 %v596_v16, %v643_v42  ;;  %v654_v58 = vsub.f32 %v1365_v6, %v643_v42 }
 0x1b1   : > { %1039 = vpow2.f32 %v660_v54  ;;  %v655_v56 = vsub.f32 %v1370_v12, %v643_v42  ;;  %v656_v53 = vsub.f32 %v609_v24, %v643_v42  ;;  %v658_v1 = vsub.f32 %v1374_v21, %v643_v42 }
 0x1b2   : > { %1041 = vpow2.f32 %v662_v57  ;;  %v672_v2 = vmul.f32 1.442695, %v650_v50  ;;  %v659_v60 = vsub.f32 %v620_v27, %v643_v42  ;;  %v674_v3 = vmul.f32 1.442695, %v651_v59 }
 0x1b3   : > { %1043 = vpow2.f32 %v664_v61  ;;  %v676_v4 = vmul.f32 1.442695, %v652_v62  ;;  %v678_v5 = vmul.f32 1.442695, %v653_v0  ;;  %v680_v7 = vmul.f32 1.442695, %v654_v58 }
 0x1b4   : > { %1045 = vpow2.f32 %v666_v55  ;;  %v682_v8 = vmul.f32 1.442695, %v655_v56  ;;  %v684_v6 = vmul.f32 1.442695, %v656_v53  ;;  %v688_v10 = vmul.f32 1.442695, %v658_v1 }
 0x1b5   : > { %1047 = vpow2.f32 %v668_v63  ;;  %v690_v12 = vmul.f32 1.442695, %v659_v60  ;;  %v751_v42 = vshrl.u32 %v750_v40, 7 }
 0x1b6   : > { %1049 = vpow2.f32 %v670_v52 }
 0x1b7   : > { %1051 = vpow2.f32 %v672_v2  ;;  %v752_v43 = vsub.s32 0, %v751_v42 }
 0x1b8   : > { %1053 = vpow2.f32 %v674_v3 }
 0x1b9   : > { %1055 = vpow2.f32 %v676_v4 }
 0x1ba   : > { %v1038_v9 = vpop.eup %1037  ;;  %1057 = vpow2.f32 %v678_v5 }
 0x1bb   : > { %v1040_v11 = vpop.eup %1039  ;;  %1059 = vpow2.f32 %v680_v7 }
 0x1bc   : > { %v1042_v13 = vpop.eup %1041  ;;  %1061 = vpow2.f32 %v682_v8 }
 0x1bd   : > { %v1044_v14 = vpop.eup %1043  ;;  %v692_v15 = vpack.c.bf16 %v1042_v13, %v1040_v11  ;;  %1063 = vpow2.f32 %v684_v6 }
 0x1be   : > { %v1046_v16 = vpop.eup %1045  ;;  %1065 = vpow2.f32 %v688_v10 }
 0x1bf   : > { %v1048_v17 = vpop.eup %1047  ;;  %948 = vmatpush3.bf16.msra.mxu1 %v692_v15  ;;  %v693_v18 = vpack.c.bf16 %v1046_v16, %v1044_v14  ;;  %1067 = vpow2.f32 %v690_v12 }
 0x1c0   : > { %v1050_v19 = vpop.eup %1049  ;;  %949 = vmatprep.subr.bf16.mxu1 %v1152_v36 }
 0x1c1   : > { %v1052_v20 = vpop.eup %1051  ;;  %v694_v21 = vpack.c.bf16 %v1050_v19, %v1048_v17 }
 0x1c2   : > { %v1054_v22 = vpop.eup %1053 }
 0x1c3   : > { %v1056_v23 = vpop.eup %1055  ;;  %950 = vmatpush3.bf16.msra.mxu1 %v693_v18  ;;  %v695_v24 = vpack.c.bf16 %v1054_v22, %v1052_v20 }
 0x1c4   : > { %v1058_v25 = vpop.eup %1057  ;;  %951 = vmatprep.subr.bf16.mxu1 %v1152_v36 }
 0x1c5   : > { %v1060_v26 = vpop.eup %1059  ;;  %v696_v27 = vpack.c.bf16 %v1058_v25, %v1056_v23 }
 0x1c6   : > { %v1062_v28 = vpop.eup %1061 }
 0x1c7   : > { %v1064_v29 = vpop.eup %1063  ;;  %952 = vmatpush3.bf16.msra.mxu1 %v694_v21  ;;  %v697_v30 = vpack.c.bf16 %v1062_v28, %v1060_v26 }
 0x1c8   : > { %v1066_v31 = vpop.eup %1065  ;;  %953 = vmatprep.subr.bf16.mxu1 %v1152_v36  ;;  %v698_v32 = vpack.c.bf16 %v1038_v9, %v1064_v29 }
 0x1c9   : > { %v1068_v33 = vpop.eup %1067 }
 0x1ca   : > { %v699_v34 = vpack.c.bf16 %v1068_v33, %v1066_v31 }
 0x1cb   : > { %954 = vmatpush3.bf16.msra.mxu1 %v695_v24 }
 0x1cc   : > { %955 = vmatprep.subr.bf16.mxu1 %v1152_v36 }
 0x1cf   : > { %956 = vmatpush3.bf16.msra.mxu1 %v696_v27 }
 0x1d0   : > { %957 = vmatprep.subr.bf16.mxu1 %v1152_v36 }
 0x1d3   : > { %958 = vmatpush3.bf16.msra.mxu1 %v697_v30 }
 0x1d4   : > { %959 = vmatprep.subr.bf16.mxu1 %v1152_v36 }
 0x1d7   : > { %960 = vmatpush3.bf16.msra.mxu1 %v698_v32 }
 0x1d8   : > { %961 = vmatprep.subr.bf16.mxu1 %v1152_v36 }
 0x1db   : > { %962 = vmatpush3.bf16.msra.mxu1 %v699_v34 }
 0x1de   : > { %964 = vmatmul.mubr.bf16.vlgmr.msra.gmra.mrb[0].mxu1 %v1036_v35 }
 0x2b1   : > { %v742_v37 = vpop.f32.mrb[0].mxu1 }
 0x2b2   : > { %v965_v38 = vpop.f32.mrb[1].mxu1 }
 0x2b3   : > { %v745_v39 = vpop.f32.mrb[2].mxu1 }
 0x2b4   : > { %1069 = vrcp.f32 %v745_v39  ;;  %v966_v41 = vpop.f32.mrb[3].mxu1 }
 0x2be   : > { %v1070_v44 = vpop.eup %1069 }
 0x2bf   : > { %v753_v36 = vrot.slane %v1070_v44, %v752_v43 }
 0x2c1   : > { %v754_v45 = vmul.f32 %v753_v36, %v742_v37 }
 0x2c3   : > { %755 = vst [vmem:[%s305_s28] sm:$0xff] %v754_v45 }
 0x2c4   : > { %1084 = shalt.err (!%p1081_p5)
}
 0x2c5   : > { %s1085_s11 = scalar_lea.hbm %s1403_s8, 128  ;;  %s1089_s19 = scalar_lea.hbm %s1456_s6, 256 }
 0x2c6   : > { %p1086_p6 = scmp.ne.s32.totalorder %s1403_s8, %s1085_s11  ;;  %p1090_p10 = scmp.lt.u32.totalorder %s1403_s8, %s1456_s6 }
 0x2c7   : > { %p1091_p11 = scmp.lt.u32.totalorder %s1089_s19, %s1085_s11  ;;  %p1093_p13 = scmp.lt.u32.totalorder %s1085_s11, %s1403_s8 }
 0x2c8   : > { %p1087_p7 = pnand %p1086_p6, %p1230_p4 }
 0x2c9   : > { %p1092_p12 = por %p1091_p11, %p1090_p10 }
 0x2ca   : > { %p1088_p9 = pneg %p1087_p7 }
 0x2cb   : > { %p1094_p0 = por %p1093_p13, %p1092_p12 }
 0x2cd   : > { %p1095_p1 = pnand %p1094_p0, %p1088_p9 }
 0x2cf   : > { %1098 = shalt.err (!%p1095_p1)
}
 0x2d0   : > { %968 = dma.vmem_to_hbm [thread:$0]  (%p1230_p4), %s1405_s30, 128, %s1403_s8, %s757_s13  }
 0x2d1 PF: > { %p974_p2 = scmp.ge.s32.totalorder %s1149_s26, 2  ;;  %s783_s12 = sand.u32 1, %s1129_s21  }
 0x2d2   : > { %s784_s27 = scalar_lea.sflag [#allocation3], %s783_s12 }
 0x2d3   : > { %p971_p3 = pnand %p974_p2, %p1237_p8 }
 0x2d5   : > { %1124 = dma.done.wait (!%p971_p3), %s784_s27, 128  }
 0x2d6   : > { %1126 = vsyncadd (!%p971_p3), %s784_s27, 4294967168  ;;  %s19_s26 = sadd.s32 1, %s1149_s26   ;;  %s1459_s21 = smov %s1133_s22 }
 0x2d7   : > { %p16_p5 = scmp.ge.s32.totalorder %s19_s26, 4   ;;  %s1460_s22 = smov %s1137_s23 }
 0x2d8   : > { %s1461_s23 = smov %s1243_s10  ;;  %s1462_s24 = smov %s1145_s25 }
 0x2d9   : > { %s1463_s25 = smov %s1465_s29  ;;  %18 = sbr.rel (!%p16_p5) target bundleno = 4 (0x4), region = 88 }
 0x2e0   :  { %789 = vsyncpa [#allocation3], 1 }
 0x2e1   :  { %791 = vsyncpa [#allocation3 + $0x1], 1 }

</bundles_post_ra>
